<compile_context>
chip_gen: v7x
topology: tpu7x:2x2x1
jax: 0.10.0
libtpu: 0.0.40
codegen_flags: <defaults>
</compile_context>

<pallas_src>
import functools

import jax
import jax.numpy as jnp
from jax import lax
from jax.experimental import pallas as pl
from jax.experimental.pallas import tpu as pltpu

LN_EPS = 1e-5


# ----------------------------------------------------------------------------
# Kernel
# ----------------------------------------------------------------------------
def critic_kernel(obs_dim, act_dim, chunk,
                  oa_ref,
                  w_oa_ref, b_oa_ref,
                  w_c2_ref, b_c2_ref,
                  w_c_ref, b_c_ref,
                  out_ref):
    d_in = obs_dim + act_dim
    tb = oa_ref.shape[0]
    n_chunks = tb // chunk        # wrapper guarantees exact division

    # Weights/biases are VMEM-resident (constant index_maps); hoist their
    # reads above the strip-mine loop so they are not re-issued per chunk.
    w_oa = w_oa_ref[...]          # (d_in, 2*nu1)  block-diag, LN affine folded
    b_oa = b_oa_ref[...]          # (1, 2*nu1)
    w_c2 = w_c2_ref[...]          # (2*nu1, nu2)   LN affine folded
    b_c2 = b_c2_ref[...]          # (1, nu2)
    w_c = w_c_ref[...]            # (1, nu2)
    b_c = b_c_ref[...]            # (1, 1)

    # Obs/act column mask generated in-kernel (no extra input DMA / buffer).
    mask_bool = jax.lax.broadcasted_iota(jnp.int32, (1, d_in), 1) < obs_dim
    mask_f = mask_bool.astype(jnp.float32)

    inv_no = 1.0 / float(obs_dim)
    inv_na = 1.0 / float(act_dim)

    def process_chunk(r0):
        oa = oa_ref[pl.ds(r0, chunk), :]                 # (chunk, d_in)
        x2 = oa * oa

        # Segment-wise LayerNorm stats, single pass (sum / sum-of-squares).
        # Act-segment sums come from (total - obs) -- saves two full-tile
        # multiplies.  NOTE: E[x^2]-E[x]^2 can cancel when |mean| >> std;
        # clamp at 0 so rsqrt never sees a tiny negative.
        # TODO(synk): if a bundle dump shows the XLU (cross-lane reduce) slot
        # binding on v6e/v7x, push these stats onto the under-used MXU via a
        # (chunk, d_in) @ (d_in, 4) matmul; skipped to keep f32 stat precision.
        sum_all = jnp.sum(oa, axis=-1, keepdims=True)
        sum_o = jnp.sum(oa * mask_f, axis=-1, keepdims=True)
        sum2_all = jnp.sum(x2, axis=-1, keepdims=True)
        sum2_o = jnp.sum(x2 * mask_f, axis=-1, keepdims=True)
        mean_o = sum_o * inv_no
        mean_a = (sum_all - sum_o) * inv_na
        var_o = jnp.maximum(sum2_o * inv_no - mean_o * mean_o, 0.0)
        var_a = jnp.maximum((sum2_all - sum2_o) * inv_na - mean_a * mean_a, 0.0)
        inv_o = lax.rsqrt(var_o + LN_EPS)
        inv_a = lax.rsqrt(var_a + LN_EPS)
        mean_sel = jnp.where(mask_bool, mean_o, mean_a)  # (chunk, d_in)
        inv_sel = jnp.where(mask_bool, inv_o, inv_a)
        x_norm = (oa - mean_sel) * inv_sel

        # Fused block-diagonal (obs|act) Linear -> ReLU  ==> x_cat directly.
        # Default dot precision (single bf16 MXU pass) on purpose.
        x_cat = jnp.dot(x_norm, w_oa, preferred_element_type=jnp.float32)
        x_cat = jnp.maximum(x_cat + b_oa, 0.0)           # (chunk, 2*nu1)

        # LayerNorm (affine folded into w_c2/b_c2) -> Linear -> ReLU.
        inv_n2 = 1.0 / float(x_cat.shape[-1])
        m2 = jnp.sum(x_cat, axis=-1, keepdims=True) * inv_n2
        v2 = jnp.maximum(
            jnp.sum(x_cat * x_cat, axis=-1, keepdims=True) * inv_n2 - m2 * m2,
            0.0)
        xn2 = (x_cat - m2) * lax.rsqrt(v2 + LN_EPS)
        x = jnp.dot(xn2, w_c2, preferred_element_type=jnp.float32)
        x = jnp.maximum(x + b_c2, 0.0)                   # (chunk, nu2)

        # Value head: N=1, so VPU multiply + lane reduction (no MXU push).
        value = jnp.sum(x * w_c, axis=-1, keepdims=True) + b_c
        # TODO(synk): out last-dim=1 -> masked vst; only switch to a
        # lane-dense (1, tb) layout if xprof shows the writeback exposed
        # (output is only 4 B/row vs ~96 B/row input).
        out_ref[pl.ds(r0, chunk), :] = value

    if n_chunks == 1:
        process_chunk(0)
    else:
        # fori_loop (not a static Python loop) so chunk live ranges are
        # bounded and intermediates never exceed the 64-vreg file.
        def body(c, carry):
            process_chunk(pl.multiple_of(c * chunk, chunk))
            return carry
        lax.fori_loop(0, n_chunks, body, 0)


# ----------------------------------------------------------------------------
# Host-side param folding / tiling plan / wrapper
# ----------------------------------------------------------------------------
def fold_params(p, obs_dim, act_dim):
    """Build block-diagonal obs/act weight and fold LN affines into linears."""
    nu1 = p["w_o"].shape[1]
    d_in = obs_dim + act_dim

    w_oa = jnp.zeros((d_in, 2 * nu1), jnp.float32)
    w_oa = w_oa.at[:obs_dim, :nu1].set(p["w_o"])
    w_oa = w_oa.at[obs_dim:, nu1:].set(p["w_a"])
    gamma_cat = jnp.concatenate([p["ln_o_g"], p["ln_a_g"]])
    beta_cat = jnp.concatenate([p["ln_o_b"], p["ln_a_b"]])
    b_cat = jnp.concatenate([p["b_o"], p["b_a"]])
    w_oa_f = gamma_cat[:, None] * w_oa
    b_oa_f = (b_cat + beta_cat @ w_oa)[None, :]

    w_c2_f = p["ln_c2_g"][:, None] * p["w_c2"]
    b_c2_f = (p["b_c2"] + p["ln_c2_b"] @ p["w_c2"])[None, :]

    w_c = p["w_c"].reshape(1, -1)      # (1, num_units_2)
    b_c = p["b_c"].reshape(1, 1)
    return w_oa_f, b_oa_f, w_c2_f, b_c2_f, w_c, b_c


def _plan_tiling(batch, block_batch=None, chunk_rows=None):
    """Return (tile_rows, chunk_rows, padded_batch).

    Large batches: big tiles (512-1024) amortize the ~0.35us/grid-step
    overhead; the in-kernel strip-mine (<=256 rows) bounds vreg pressure;
    the tile is capped so there are >=2 grid tiles (v7x megacore).
    """
    if block_batch is not None:
        tb = block_batch
        chunk = chunk_rows if chunk_rows is not None else min(256, tb)
        assert tb % 8 == 0 and tb % chunk == 0
        num_tiles = -(-batch // tb)
        return tb, chunk, num_tiles * tb

    b8 = max(8, ((batch + 7) // 8) * 8)
    if b8 <= 256:
        return b8, b8, b8                      # single tile, single chunk
    chunk = 256
    half = -(-batch // 2)
    tb = min(1024, ((half + chunk - 1) // chunk) * chunk)
    num_tiles = -(-batch // tb)
    return tb, chunk, num_tiles * tb


def critic_forward(obs, action, params, block_batch=None, chunk_rows=None):
    obs = obs.astype(jnp.float32)
    action = action.astype(jnp.float32)
    batch, obs_dim = obs.shape
    act_dim = action.shape[1]
    d_in = obs_dim + act_dim

    w_oa, b_oa, w_c2, b_c2, w_c, b_c = fold_params(params, obs_dim, act_dim)
    nu_cat = w_oa.shape[1]
    nu2 = w_c2.shape[1]

    # Concatenate obs|act once in the wrapper (layout plumbing, not compute).
    oa = jnp.concatenate([obs, action], axis=1)

    tb, chunk, b_pad = _plan_tiling(batch, block_batch, chunk_rows)
    num_tiles = b_pad // tb
    if b_pad != batch:
        # Zero-padded rows give var=0 -> rsqrt(eps); finite and discarded.
        oa = jnp.pad(oa, ((0, b_pad - batch), (0, 0)))

    const = lambda i: (0, 0)
    kern = functools.partial(critic_kernel, obs_dim, act_dim, chunk)

    out = pl.pallas_call(
        kern,
        out_shape=jax.ShapeDtypeStruct((b_pad, 1), jnp.float32),
        grid=(num_tiles,),
        in_specs=[
            pl.BlockSpec((tb, d_in), lambda i: (i, 0)),   # activations: tiled
            pl.BlockSpec((d_in, nu_cat), const),          # weights: resident
            pl.BlockSpec((1, nu_cat), const),
            pl.BlockSpec((nu_cat, nu2), const),
            pl.BlockSpec((1, nu2), const),
            pl.BlockSpec((1, nu2), const),
            pl.BlockSpec((1, 1), const),
        ],
        out_specs=pl.BlockSpec((tb, 1), lambda i: (i, 0)),
        compiler_params=pltpu.CompilerParams(
            dimension_semantics=("parallel",)),
    )(oa, w_oa, b_oa, w_c2, b_c2, w_c, b_c)
    return out[:batch]


# ----------------------------------------------------------------------------
# Params (PyTorch-default init + reset_parameters()) and pure-JAX reference
# ----------------------------------------------------------------------------
def init_params(key, obs_dim, act_dim, num_units_1, num_units_2):
    gain = (2.0 / (1.0 + 0.01 ** 2)) ** 0.5  # calculate_gain('leaky_relu')

    def linear(key, in_f, out_f, scale_w):
        kw, kb = jax.random.split(key)
        bound = 1.0 / (in_f ** 0.5)
        # PyTorch stores weight as (out, in); pre-transpose to (in, out).
        w = jax.random.uniform(kw, (out_f, in_f), jnp.float32, -bound, bound)
        b = jax.random.uniform(kb, (out_f,), jnp.float32, -bound, bound)
        return (w * scale_w).T, b

    k1, k2, k3, k4 = jax.random.split(key, 4)
    w_o, b_o = linear(k1, obs_dim, num_units_1, gain)
    w_a, b_a = linear(k2, act_dim, num_units_1, gain)
    w_c2, b_c2 = linear(k3, num_units_1 * 2, num_units_2, gain)
    w_c, b_c = linear(k4, num_units_2, 1, gain)

    return {
        "ln_o_g": jnp.ones((obs_dim,), jnp.float32),
        "ln_o_b": jnp.zeros((obs_dim,), jnp.float32),
        "w_o": w_o, "b_o": b_o,
        "ln_a_g": jnp.ones((act_dim,), jnp.float32),
        "ln_a_b": jnp.zeros((act_dim,), jnp.float32),
        "w_a": w_a, "b_a": b_a,
        "ln_c2_g": jnp.ones((num_units_1 * 2,), jnp.float32),
        "ln_c2_b": jnp.zeros((num_units_1 * 2,), jnp.float32),
        "w_c2": w_c2, "b_c2": b_c2,
        "w_c": w_c, "b_c": b_c,
    }


def reference_forward(obs, action, p):
    """Pure-JAX reference mirroring the PyTorch forward exactly."""
    def ln(x, g, b):
        m = jnp.mean(x, axis=-1, keepdims=True)
        v = jnp.mean((x - m) ** 2, axis=-1, keepdims=True)
        return (x - m) / jnp.sqrt(v + LN_EPS) * g + b

    x_o = jax.nn.relu(ln(obs, p["ln_o_g"], p["ln_o_b"]) @ p["w_o"] + p["b_o"])
    x_a = jax.nn.relu(ln(action, p["ln_a_g"], p["ln_a_b"]) @ p["w_a"] + p["b_a"])
    x_cat = jnp.concatenate([x_o, x_a], axis=1)
    x = jax.nn.relu(ln(x_cat, p["ln_c2_g"], p["ln_c2_b"]) @ p["w_c2"] + p["b_c2"])
    return x @ p["w_c"] + p["b_c"]


if __name__ == "__main__":
    batch, obs_dim, act_dim = 8, 16, 8
    num_units_1, num_units_2 = 64, 64

    key = jax.random.PRNGKey(0)
    k_obs, k_act, k_params = jax.random.split(key, 3)
    obs = jax.random.normal(k_obs, (batch, obs_dim), jnp.float32)
    action = jax.random.normal(k_act, (batch, act_dim), jnp.float32)
    params = init_params(k_params, obs_dim, act_dim, num_units_1, num_units_2)

    value = critic_forward(obs, action, params)
    jax.block_until_ready(value)
    ref = reference_forward(obs, action, params)
    assert value.shape == (batch, 1)
    assert jnp.allclose(value, ref, atol=1e-4, rtol=1e-4), (
        f"small-batch mismatch: max abs err {jnp.max(jnp.abs(value - ref))}")

    # Also exercise the multi-tile grid + in-kernel strip-mine (fori_loop) path.
    # Looser tolerance: the value head is exact f32 in the kernel but a bf16
    # MXU pass in the reference.
    batch2 = 600
    k_o2, k_a2 = jax.random.split(jax.random.PRNGKey(1), 2)
    obs2 = jax.random.normal(k_o2, (batch2, obs_dim), jnp.float32)
    act2 = jax.random.normal(k_a2, (batch2, act_dim), jnp.float32)
    value2 = critic_forward(obs2, act2, params)
    jax.block_until_ready(value2)
    ref2 = reference_forward(obs2, act2, params)
    assert value2.shape == (batch2, 1)
    assert jnp.allclose(value2, ref2, atol=1e-3, rtol=1e-3), (
        f"large-batch mismatch: max abs err {jnp.max(jnp.abs(value2 - ref2))}")

    print("KERNEL_OK")
</pallas_src>

<mosaic_0001>
module attributes {stable_mosaic.version = 11 : i64} {
  func.func @critic_kernel(%arg0: i32, %arg1: memref<8x24xf32, #tpu.memory_space<vmem>>, %arg2: memref<24x128xf32, #tpu.memory_space<vmem>>, %arg3: memref<1x128xf32, #tpu.memory_space<vmem>>, %arg4: memref<128x64xf32, #tpu.memory_space<vmem>>, %arg5: memref<1x64xf32, #tpu.memory_space<vmem>>, %arg6: memref<1x64xf32, #tpu.memory_space<vmem>>, %arg7: memref<1x1xf32, #tpu.memory_space<vmem>>, %arg8: memref<8x1xf32, #tpu.memory_space<vmem>>) attributes {dimension_semantics = [#tpu.dimension_semantics<parallel>], iteration_bounds = array<i64: 1>, scalar_prefetch = 0 : i64, scratch_operands = 0 : i64, tpu.core_type = #tpu.core_type<tc>, window_params = [{transform_indices = @transform_0, window_bounds = array<i64: 8, 24>}, {pipeline_mode = #tpu.pipeline_mode<synchronous>, transform_indices = @transform_1, window_bounds = array<i64: 24, 128>}, {pipeline_mode = #tpu.pipeline_mode<synchronous>, transform_indices = @transform_2, window_bounds = array<i64: 1, 128>}, {pipeline_mode = #tpu.pipeline_mode<synchronous>, transform_indices = @transform_3, window_bounds = array<i64: 128, 64>}, {pipeline_mode = #tpu.pipeline_mode<synchronous>, transform_indices = @transform_4, window_bounds = array<i64: 1, 64>}, {pipeline_mode = #tpu.pipeline_mode<synchronous>, transform_indices = @transform_5, window_bounds = array<i64: 1, 64>}, {pipeline_mode = #tpu.pipeline_mode<synchronous>, transform_indices = @transform_6, window_bounds = array<i64: 1, 1>}, {transform_indices = @transform_7, window_bounds = array<i64: 8, 1>}]} {
    %c0 = arith.constant 0 : index
    %c0_0 = arith.constant 0 : index
    %0 = vector.load %arg2[%c0, %c0_0] : memref<24x128xf32, #tpu.memory_space<vmem>>, vector<24x128xf32>
    %c0_1 = arith.constant 0 : index
    %c0_2 = arith.constant 0 : index
    %1 = vector.load %arg3[%c0_1, %c0_2] : memref<1x128xf32, #tpu.memory_space<vmem>>, vector<1x128xf32>
    %c0_3 = arith.constant 0 : index
    %c0_4 = arith.constant 0 : index
    %2 = vector.load %arg4[%c0_3, %c0_4] : memref<128x64xf32, #tpu.memory_space<vmem>>, vector<128x64xf32>
    %c0_5 = arith.constant 0 : index
    %c0_6 = arith.constant 0 : index
    %3 = vector.load %arg5[%c0_5, %c0_6] : memref<1x64xf32, #tpu.memory_space<vmem>>, vector<1x64xf32>
    %c0_7 = arith.constant 0 : index
    %c0_8 = arith.constant 0 : index
    %4 = vector.load %arg6[%c0_7, %c0_8] : memref<1x64xf32, #tpu.memory_space<vmem>>, vector<1x64xf32>
    %c0_9 = arith.constant 0 : index
    %c0_10 = arith.constant 0 : index
    %5 = vector.load %arg7[%c0_9, %c0_10] : memref<1x1xf32, #tpu.memory_space<vmem>>, vector<1x1xf32>
    %6 = tpu.iota {dimensions = array<i32: 1>} : vector<1x24xi32>
    %c16_i32 = arith.constant 16 : i32
    %7 = vector.broadcast %c16_i32 : i32 to vector<1x24xi32>
    %8 = arith.cmpi slt, %6, %7 : vector<1x24xi32>
    %9 = arith.extui %8 : vector<1x24xi1> to vector<1x24xi32>
    %10 = arith.sitofp %9 : vector<1x24xi32> to vector<1x24xf32>
    %c0_11 = arith.constant 0 : index
    %c0_12 = arith.constant 0 : index
    %11 = vector.load %arg1[%c0_11, %c0_12] : memref<8x24xf32, #tpu.memory_space<vmem>>, vector<8x24xf32>
    %12 = arith.mulf %11, %11 : vector<8x24xf32>
    %cst = arith.constant dense<0.000000e+00> : vector<8xf32>
    %13 = vector.multi_reduction <add>, %11, %cst [1] : vector<8x24xf32> to vector<8xf32>
    %14 = vector.shape_cast %13 : vector<8xf32> to vector<8x1xf32>
    %15 = vector.broadcast %10 : vector<1x24xf32> to vector<8x24xf32>
    %16 = arith.mulf %11, %15 : vector<8x24xf32>
    %cst_13 = arith.constant dense<0.000000e+00> : vector<8xf32>
    %17 = vector.multi_reduction <add>, %16, %cst_13 [1] : vector<8x24xf32> to vector<8xf32>
    %18 = vector.shape_cast %17 : vector<8xf32> to vector<8x1xf32>
    %cst_14 = arith.constant dense<0.000000e+00> : vector<8xf32>
    %19 = vector.multi_reduction <add>, %12, %cst_14 [1] : vector<8x24xf32> to vector<8xf32>
    %20 = vector.shape_cast %19 : vector<8xf32> to vector<8x1xf32>
    %21 = vector.broadcast %10 : vector<1x24xf32> to vector<8x24xf32>
    %22 = arith.mulf %12, %21 : vector<8x24xf32>
    %cst_15 = arith.constant dense<0.000000e+00> : vector<8xf32>
    %23 = vector.multi_reduction <add>, %22, %cst_15 [1] : vector<8x24xf32> to vector<8xf32>
    %24 = vector.shape_cast %23 : vector<8xf32> to vector<8x1xf32>
    %cst_16 = arith.constant 6.250000e-02 : f32
    %25 = vector.broadcast %cst_16 : f32 to vector<8x1xf32>
    %26 = arith.mulf %18, %25 : vector<8x1xf32>
    %27 = arith.subf %14, %18 : vector<8x1xf32>
    %cst_17 = arith.constant 1.250000e-01 : f32
    %28 = vector.broadcast %cst_17 : f32 to vector<8x1xf32>
    %29 = arith.mulf %27, %28 : vector<8x1xf32>
    %cst_18 = arith.constant 6.250000e-02 : f32
    %30 = vector.broadcast %cst_18 : f32 to vector<8x1xf32>
    %31 = arith.mulf %24, %30 : vector<8x1xf32>
    %32 = arith.mulf %26, %26 : vector<8x1xf32>
    %33 = arith.subf %31, %32 : vector<8x1xf32>
    %cst_19 = arith.constant 0.000000e+00 : f32
    %34 = vector.broadcast %cst_19 : f32 to vector<8x1xf32>
    %35 = arith.maximumf %33, %34 : vector<8x1xf32>
    %36 = arith.subf %20, %24 : vector<8x1xf32>
    %cst_20 = arith.constant 1.250000e-01 : f32
    %37 = vector.broadcast %cst_20 : f32 to vector<8x1xf32>
    %38 = arith.mulf %36, %37 : vector<8x1xf32>
    %39 = arith.mulf %29, %29 : vector<8x1xf32>
    %40 = arith.subf %38, %39 : vector<8x1xf32>
    %cst_21 = arith.constant 0.000000e+00 : f32
    %41 = vector.broadcast %cst_21 : f32 to vector<8x1xf32>
    %42 = arith.maximumf %40, %41 : vector<8x1xf32>
    %cst_22 = arith.constant 9.99999974E-6 : f32
    %43 = vector.broadcast %cst_22 : f32 to vector<8x1xf32>
    %44 = arith.addf %35, %43 : vector<8x1xf32>
    %45 = math.rsqrt %44 : vector<8x1xf32>
    %cst_23 = arith.constant 9.99999974E-6 : f32
    %46 = vector.broadcast %cst_23 : f32 to vector<8x1xf32>
    %47 = arith.addf %42, %46 : vector<8x1xf32>
    %48 = math.rsqrt %47 : vector<8x1xf32>
    %49 = vector.shape_cast %8 : vector<1x24xi1> to vector<1x24xi1>
    %50 = vector.broadcast %49 : vector<1x24xi1> to vector<8x24xi1>
    %51 = vector.shape_cast %26 : vector<8x1xf32> to vector<8x1xf32>
    %52 = vector.broadcast %51 : vector<8x1xf32> to vector<8x24xf32>
    %53 = vector.shape_cast %29 : vector<8x1xf32> to vector<8x1xf32>
    %54 = vector.broadcast %53 : vector<8x1xf32> to vector<8x24xf32>
    %55 = arith.select %50, %52, %54 : vector<8x24xi1>, vector<8x24xf32>
    %56 = vector.shape_cast %8 : vector<1x24xi1> to vector<1x24xi1>
    %57 = vector.broadcast %56 : vector<1x24xi1> to vector<8x24xi1>
    %58 = vector.shape_cast %45 : vector<8x1xf32> to vector<8x1xf32>
    %59 = vector.broadcast %58 : vector<8x1xf32> to vector<8x24xf32>
    %60 = vector.shape_cast %48 : vector<8x1xf32> to vector<8x1xf32>
    %61 = vector.broadcast %60 : vector<8x1xf32> to vector<8x24xf32>
    %62 = arith.select %57, %59, %61 : vector<8x24xi1>, vector<8x24xf32>
    %63 = arith.subf %11, %55 : vector<8x24xf32>
    %64 = arith.mulf %63, %62 : vector<8x24xf32>
    %cst_24 = arith.constant dense<0.000000e+00> : vector<8x128xf32>
    %65 = tpu.matmul %64, %0, %cst_24 {dimension_numbers = #tpu.dot_dimension_numbers<[1], [0], [0], [1], [0, 0, 1, 1], [], []>} : vector<8x24xf32>, vector<24x128xf32>, vector<8x128xf32> -> vector<8x128xf32>
    %66 = vector.broadcast %1 : vector<1x128xf32> to vector<8x128xf32>
    %67 = arith.addf %65, %66 : vector<8x128xf32>
    %cst_25 = arith.constant 0.000000e+00 : f32
    %68 = vector.broadcast %cst_25 : f32 to vector<8x128xf32>
    %69 = arith.maximumf %67, %68 : vector<8x128xf32>
    %cst_26 = arith.constant dense<0.000000e+00> : vector<8xf32>
    %70 = vector.multi_reduction <add>, %69, %cst_26 [1] : vector<8x128xf32> to vector<8xf32>
    %71 = vector.shape_cast %70 : vector<8xf32> to vector<8x1xf32>
    %cst_27 = arith.constant 7.812500e-03 : f32
    %72 = vector.broadcast %cst_27 : f32 to vector<8x1xf32>
    %73 = arith.mulf %71, %72 : vector<8x1xf32>
    %74 = arith.mulf %69, %69 : vector<8x128xf32>
    %cst_28 = arith.constant dense<0.000000e+00> : vector<8xf32>
    %75 = vector.multi_reduction <add>, %74, %cst_28 [1] : vector<8x128xf32> to vector<8xf32>
    %76 = vector.shape_cast %75 : vector<8xf32> to vector<8x1xf32>
    %cst_29 = arith.constant 7.812500e-03 : f32
    %77 = vector.broadcast %cst_29 : f32 to vector<8x1xf32>
    %78 = arith.mulf %76, %77 : vector<8x1xf32>
    %79 = arith.mulf %73, %73 : vector<8x1xf32>
    %80 = arith.subf %78, %79 : vector<8x1xf32>
    %cst_30 = arith.constant 0.000000e+00 : f32
    %81 = vector.broadcast %cst_30 : f32 to vector<8x1xf32>
    %82 = arith.maximumf %80, %81 : vector<8x1xf32>
    %83 = vector.broadcast %73 : vector<8x1xf32> to vector<8x128xf32>
    %84 = arith.subf %69, %83 : vector<8x128xf32>
    %cst_31 = arith.constant 9.99999974E-6 : f32
    %85 = vector.broadcast %cst_31 : f32 to vector<8x1xf32>
    %86 = arith.addf %82, %85 : vector<8x1xf32>
    %87 = math.rsqrt %86 : vector<8x1xf32>
    %88 = vector.broadcast %87 : vector<8x1xf32> to vector<8x128xf32>
    %89 = arith.mulf %84, %88 : vector<8x128xf32>
    %cst_32 = arith.constant dense<0.000000e+00> : vector<8x64xf32>
    %90 = tpu.matmul %89, %2, %cst_32 {dimension_numbers = #tpu.dot_dimension_numbers<[1], [0], [0], [1], [0, 0, 1, 1], [], []>} : vector<8x128xf32>, vector<128x64xf32>, vector<8x64xf32> -> vector<8x64xf32>
    %91 = vector.broadcast %3 : vector<1x64xf32> to vector<8x64xf32>
    %92 = arith.addf %90, %91 : vector<8x64xf32>
    %cst_33 = arith.constant 0.000000e+00 : f32
    %93 = vector.broadcast %cst_33 : f32 to vector<8x64xf32>
    %94 = arith.maximumf %92, %93 : vector<8x64xf32>
    %95 = vector.broadcast %4 : vector<1x64xf32> to vector<8x64xf32>
    %96 = arith.mulf %94, %95 : vector<8x64xf32>
    %cst_34 = arith.constant dense<0.000000e+00> : vector<8xf32>
    %97 = vector.multi_reduction <add>, %96, %cst_34 [1] : vector<8x64xf32> to vector<8xf32>
    %98 = vector.shape_cast %97 : vector<8xf32> to vector<8x1xf32>
    %99 = vector.broadcast %5 : vector<1x1xf32> to vector<8x1xf32>
    %100 = arith.addf %98, %99 : vector<8x1xf32>
    %c0_35 = arith.constant 0 : index
    %c0_36 = arith.constant 0 : index
    %101 = vector.load %arg8[%c0_35, %c0_36] : memref<8x1xf32, #tpu.memory_space<vmem>>, vector<8x1xf32>
    tpu.vector_store %arg8[%c0_35, %c0_36], %100 {strides = array<i32>} : memref<8x1xf32, #tpu.memory_space<vmem>>, vector<8x1xf32>,
    return
  }
  func.func @transform_0(%arg0: i32) -> (i32, i32) {
    %c0_i32 = arith.constant 0 : i32
    %c0_i32_0 = arith.constant 0 : i32
    return %arg0, %c0_i32 : i32, i32
  }
  func.func @transform_1(%arg0: i32) -> (i32, i32) {
    %c0_i32 = arith.constant 0 : i32
    %c0_i32_0 = arith.constant 0 : i32
    %c0_i32_1 = arith.constant 0 : i32
    return %c0_i32, %c0_i32_0 : i32, i32
  }
  func.func @transform_2(%arg0: i32) -> (i32, i32) {
    %c0_i32 = arith.constant 0 : i32
    %c0_i32_0 = arith.constant 0 : i32
    %c0_i32_1 = arith.constant 0 : i32
    return %c0_i32, %c0_i32_0 : i32, i32
  }
  func.func @transform_3(%arg0: i32) -> (i32, i32) {
    %c0_i32 = arith.constant 0 : i32
    %c0_i32_0 = arith.constant 0 : i32
    %c0_i32_1 = arith.constant 0 : i32
    return %c0_i32, %c0_i32_0 : i32, i32
  }
  func.func @transform_4(%arg0: i32) -> (i32, i32) {
    %c0_i32 = arith.constant 0 : i32
    %c0_i32_0 = arith.constant 0 : i32
    %c0_i32_1 = arith.constant 0 : i32
    return %c0_i32, %c0_i32_0 : i32, i32
  }
  func.func @transform_5(%arg0: i32) -> (i32, i32) {
    %c0_i32 = arith.constant 0 : i32
    %c0_i32_0 = arith.constant 0 : i32
    %c0_i32_1 = arith.constant 0 : i32
    return %c0_i32, %c0_i32_0 : i32, i32
  }
  func.func @transform_6(%arg0: i32) -> (i32, i32) {
    %c0_i32 = arith.constant 0 : i32
    %c0_i32_0 = arith.constant 0 : i32
    %c0_i32_1 = arith.constant 0 : i32
    return %c0_i32, %c0_i32_0 : i32, i32
  }
  func.func @transform_7(%arg0: i32) -> (i32, i32) {
    %c0_i32 = arith.constant 0 : i32
    %c0_i32_0 = arith.constant 0 : i32
    return %arg0, %c0_i32 : i32, i32
  }
}

</mosaic_0001>

<bundles_post_ra>
// kernel: tpu_custom_call.1
= control target key start
LH: loop header
LB: loop body
LE: loop exit
PB: predicated region body
PF: predicated region fallthrough
CT: control target
= control target key end

     0   :  { %vm58_vm0 = vcmask 195584   ;;  %v51_v0 = vlaneseq  ;;  %v396_v6 = vmov 0.0   ;;  %v397_v12 = vmov 0.0|0.0   ;;  %s531_s0 = inlined_call_operand.vmem [shape: f32[8,24], index: 0, kind: input, shape index: {}]   ;;  %s532_s1 = inlined_call_operand.vmem [shape: f32[24,128], index: 1, kind: input, shape index: {}]   ;;  %s533_s3 = inlined_call_operand.vmem [shape: f32[128,64], index: 3, kind: input, shape index: {}]   ;;  %s534_s2 = inlined_call_operand.vmem [shape: f32[1,128], index: 2, kind: input, shape index: {}]   ;;  %s535_s6 = inlined_call_operand.<no memory space> [shape: f32[1,1], index: 6, kind: input, shape index: {}]   ;;  %s536_s4 = inlined_call_operand.vmem [shape: f32[1,64], index: 4, kind: input, shape index: {}]   ;;  %s537_s5 = inlined_call_operand.vmem [shape: f32[1,64], index: 5, kind: input, shape index: {}]   ;;  %s538_s7 = inlined_call_operand.vmem [shape: f32[8,1], index: 7, kind: output, shape index: {}]  }
   0x1   :  { %v56_v1 = vld [vmem:[%s531_s0] sm:$0xff]  ;;  %360 = vmatprep.subr.bf16.mxu0 %v397_v12  ;;  %v29_v14 = vld [vmem:[%s532_s1 + $0x8] sm:$0xff]  ;;  %vm398_vm2 = vmmov 0   ;;  %363 = vmatprep.subr.bf16.mxu1 %v397_v12  ;;  %v30_v16 = vld [vmem:[%s532_s1 + $0x10] sm:$0xff]  ;;  %vm272_vm3 = vcmask 523264   ;;  %vm283_vm4 = vcmask 7168  }
   0x2   :  { %v59_v2 = vsel %vm58_vm0, %v56_v1, 0.0  ;;  %v57_v3 = vmul.f32 %v56_v1, %v56_v1  ;;  %v52_v4 = vand.u32 127, %v51_v0  ;;  %v28_v13 = vld [vmem:[%s532_s1] sm:$0xff]  ;;  %322 = vmatprep.mubr.msk.f32.mxu0 %vm398_vm2, %v396_v6  ;;  %357 = vmatprep.mubr.msk.f32.mxu1 %vm398_vm2, %v396_v6  ;;  %v33_v42 = vld [vmem:[%s533_s3 + $0x8] sm:$0xff]  ;;  %v34_v43 = vld [vmem:[%s533_s3 + $0x10] sm:$0xff] }
   0x3   :  { %60 = vadd.xlane.f32.xlu0 %v59_v2  ;;  %v361_v15 = vpack.c.bf16 %v29_v14, %v28_v13  ;;  %v32_v41 = vld [vmem:[%s533_s3] sm:$0xff]  ;;  %v35_v45 = vld [vmem:[%s533_s3 + $0x18] sm:$0xff]  ;;  %v37_v54 = vld [vmem:[%s533_s3 + $0x28] sm:$0xff] }
   0x4   :  { %v66_v5 = vsel %vm58_vm0, %v57_v3, 0.0  ;;  %vm53_vm1 = vcmp.lt.s32.totalorder %v52_v4, 16  ;;  %v364_v44 = vpack.c.bf16 %v33_v42, %v32_v41  ;;  %v367_v46 = vpack.c.bf16 %v35_v45, %v34_v43  ;;  %v290_v47 = vld [vmem:[%s534_s2] ss:$0 sm:$0xff]  ;;  %v38_v56 = vld [vmem:[%s533_s3 + $0x30] sm:$0xff]  ;;  %v39_v57 = vld [vmem:[%s533_s3 + $0x38] sm:$0xff] }
   0x5   :  { %67 = vadd.xlane.f32.xlu1 %v66_v5  ;;  %v289_v7 = vsel %vm53_vm1, 1.0, %v396_v6  ;;  %362 = vmatpush3.bf16.msra.mxu0 %v361_v15  ;;  %v36_v53 = vld [vmem:[%s533_s3 + $0x20] sm:$0xff]  ;;  %v373_v58 = vpack.c.bf16 %v39_v57, %v38_v56  ;;  %v41_v60 = vld [vmem:[%s533_s3 + $0x48] sm:$0xff]  ;;  %v42_v62 = vld [vmem:[%s533_s3 + $0x50] sm:$0xff] }
   0x6   :  { %v62_v8 = vmul.f32 %v289_v7, %v56_v1  ;;  %v69_v9 = vmul.f32 %v289_v7, %v57_v3  ;;  %320 = vmatprep.subr.mxu0 %v396_v6  ;;  %365 = vmatpush3.bf16.msra.mxu1 %v364_v44  ;;  %v370_v55 = vpack.c.bf16 %v37_v54, %v36_v53  ;;  %v40_v59 = vld [vmem:[%s533_s3 + $0x40] sm:$0xff]  ;;  %v43_v63 = vld [vmem:[%s533_s3 + $0x58] sm:$0xff]  ;;  %v45_v2 = vld [vmem:[%s533_s3 + $0x68] sm:$0xff] }
   0x7   :  { %366 = vmatprep.subr.bf16.mxu1 %v397_v12  ;;  %v376_v61 = vpack.c.bf16 %v41_v60, %v40_v59  ;;  %v379_v0 = vpack.c.bf16 %v43_v63, %v42_v62  ;;  %v46_v4 = vld [vmem:[%s533_s3 + $0x70] sm:$0xff]  ;;  %v47_v5 = vld [vmem:[%s533_s3 + $0x78] sm:$0xff] }
   0x8   :  { %v63_v10 = vsel %vm58_vm0, %v62_v8, 0.0  ;;  %v70_v11 = vsel %vm58_vm0, %v69_v9, 0.0  ;;  %v385_v6 = vpack.c.bf16 %v47_v5, %v46_v4 }
   0x9   :  { %64 = vadd.xlane.f32.xlu0 %v63_v10  ;;  %71 = vadd.xlane.f32.xlu1 %v70_v11 }
   0xa   :  { %321 = vmatpush3.msra.mxu0 %v30_v16  ;;  %368 = vmatpush3.bf16.msra.mxu1 %v367_v46 }
   0xb   :  { %369 = vmatprep.subr.bf16.mxu1 %v397_v12 }
   0xe   :  { %371 = vmatpush3.bf16.msra.mxu1 %v370_v55 }
   0xf   :  { %372 = vmatprep.subr.bf16.mxu1 %v397_v12 }
  0x12   :  { %374 = vmatpush3.bf16.msra.mxu1 %v373_v58 }
  0x13   :  { %375 = vmatprep.subr.bf16.mxu1 %v397_v12 }
  0x16   :  { %377 = vmatpush3.bf16.msra.mxu1 %v376_v61 }
  0x17   :  { %378 = vmatprep.subr.bf16.mxu1 %v397_v12 }
  0x1a   :  { %380 = vmatpush3.bf16.msra.mxu1 %v379_v0 }
  0x1b   :  { %381 = vmatprep.subr.bf16.mxu1 %v397_v12 }
  0x90   :  { %v61_v17 = vpop.xlane.xlu0 %60 }
  0x92   :  { %v68_v18 = vpop.xlane.xlu1 %67 }
  0x96   :  { %v65_v19 = vpop.xlane.xlu0 %64  ;;  %v72_v20 = vpop.xlane.xlu1 %71 }
  0x97   :  { %v73_v21 = vmul.f32 0.0625, %v65_v19  ;;  %v74_v22 = vsub.f32 %v61_v17, %v65_v19  ;;  %v76_v23 = vmul.f32 0.0625, %v72_v20  ;;  %v80_v24 = vsub.f32 %v68_v18, %v72_v20 }
  0x98   :  { %v12_v19 = vstv %s535_s6 }
  0x99   :  { %v75_v25 = vmul.f32 0.125, %v74_v22  ;;  %v77_v26 = vmul.f32 %v73_v21, %v73_v21  ;;  %v81_v29 = vmul.f32 0.125, %v80_v24  ;;  %13 = vst [vmem:[#allocation2] sm:$0x1] %v12_v19 }
  0x9b   :  { %v82_v27 = vmul.f32 %v75_v25, %v75_v25  ;;  %v78_v28 = vsub.f32 %v76_v23, %v77_v26  ;;  %v90_v35 = vsel %vm53_vm1, %v73_v21, %v75_v25  ;;  %v293_v23 = vld [vmem:[%s537_s5] ss:$0 sm:$0xff] }
  0x9c   :  { %v92_v38 = vsub.f32 %v56_v1, %v90_v35  ;;  %v44_v1 = vld [vmem:[%s533_s3 + $0x60] sm:$0xff] }
  0x9d   :  { %v79_v30 = vmax.f32 %v78_v28, 0.0  ;;  %v83_v31 = vsub.f32 %v81_v29, %v82_v27  ;;  %v382_v3 = vpack.c.bf16 %v45_v2, %v44_v1 }
  0x9f   :  { %v84_v32 = vmax.f32 %v83_v31, 0.0  ;;  %v85_v33 = vadd.f32 1e-05, %v79_v30  ;;  %383 = vmatpush3.bf16.msra.mxu1 %v382_v3 }
  0xa0   :  { %384 = vmatprep.subr.bf16.mxu1 %v397_v12  ;;  %v292_v12 = vld [vmem:[%s536_s4] ss:$0 sm:$0xff] }
  0xa1   :  { %v87_v34 = vadd.f32 1e-05, %v84_v32  ;;  %390 = vrsqrt.f32 %v85_v33  ;;  %v294_v27 = vld [vmem:[#allocation2] ss:$0 sm:$0xff] }
  0xa3   :  { %392 = vrsqrt.f32 %v87_v34  ;;  %386 = vmatpush3.bf16.msra.mxu1 %v385_v6 }
  0xab   :  { %v391_v36 = vpop.eup %390 }
  0xad   :  { %v393_v37 = vpop.eup %392 }
  0xae   :  { %v91_v39 = vsel %vm53_vm1, %v391_v36, %v393_v37 }
  0xaf   :  { %v93_v40 = vmul.f32 %v92_v38, %v91_v39 }
  0xb1   :  { %323 = vmatmul.mubr.msk.f32.vlgmr.msra.gmra.mrb[0].mxu0 %vm58_vm0, %v93_v40 }
 0x184   :  { %v169_v48 = vpop.f32.mrb[0].mxu0 }
 0x185   :  { %v170_v49 = vadd.f32 %v290_v47, %v169_v48  ;;  %v324_v50 = vpop.f32.mrb[1].mxu0 }
 0x187   :  { %v173_v51 = vmax.f32 %v170_v49, 0.0 }
 0x189   :  { %174 = vadd.xlane.f32.xlu0 %v173_v51  ;;  %v177_v52 = vmul.f32 %v173_v51, %v173_v51 }
 0x18b   :  { %178 = vadd.xlane.f32.xlu1 %v177_v52 }
 0x216   :  { %v175_v7 = vpop.xlane.xlu0 %174 }
 0x217   :  { %v176_v8 = vmul.f32 0.0078125, %v175_v7 }
 0x218   :  { %v179_v9 = vpop.xlane.xlu1 %178 }
 0x219   :  { %v181_v10 = vmul.f32 %v176_v8, %v176_v8  ;;  %v180_v11 = vmul.f32 0.0078125, %v179_v9  ;;  %v184_v16 = vsub.f32 %v173_v51, %v176_v8 }
 0x21b   :  { %v182_v13 = vsub.f32 %v180_v11, %v181_v10 }
 0x21d   :  { %v183_v14 = vmax.f32 %v182_v13, 0.0 }
 0x21f   :  { %v185_v15 = vadd.f32 1e-05, %v183_v14 }
 0x221   :  { %394 = vrsqrt.f32 %v185_v15 }
 0x22b   :  { %v395_v17 = vpop.eup %394 }
 0x22c   :  { %v187_v18 = vmul.f32 %v395_v17, %v184_v16 }
 0x22e   :  { %358 = vmatmul.mubr.f32.vlgmr.msra.gmra.mrb[0].mxu1 %v187_v18 }
 0x301   :  { %v260_v20 = vpop.f32.mrb[0].mxu1 }
 0x302   :  { %v261_v21 = vadd.f32 %v292_v12, %v260_v20  ;;  %v359_v22 = vpop.f32.mrb[1].mxu1 }
 0x304   :  { %v264_v24 = vmax.f32 %v261_v21, 0.0 }
 0x306   :  { %v271_v25 = vmul.f32 %v293_v23, %v264_v24 }
 0x308   :  { %v273_v26 = vsel %vm272_vm3, %v271_v25, 0.0 }
 0x309   :  { %274 = vadd.xlane.f32.xlu0 %v273_v26 }
 0x396   :  { %v275_v28 = vpop.xlane.xlu0 %274 }
 0x397   :  { %v282_v29 = vadd.f32 %v294_v27, %v275_v28 }
 0x399   :  { %284 = vst.msk [vmem:[%s538_s7] sm:$0xff] %vm283_vm4, %v282_v29 }

</bundles_post_ra>
